<compile_context>
chip_gen: v6e
topology: v6e:2x2x1
jax: 0.10.0
libtpu: 0.0.40
codegen_flags: <defaults>
</compile_context>

<pallas_src>
import functools

import jax
import jax.numpy as jnp
from jax.experimental import pallas as pl
from jax.experimental.pallas import tpu as pltpu

F_IN = 2    # fc1 in_features
HID = 8     # fc1 out_features / fc2 in_features
F_OUT = 2   # fc2 out_features


def mlp_kernel(w1_ref, b1_ref, w2_ref, b2_ref, x_ref, o_ref):
    """w1:(8,2) b1:(8,) w2:(2,8) b2:(2,) in SMEM; x:(2,TILE_B), o:(2,TILE_B) in VMEM."""
    x = x_ref[...]                      # (2, TILE_B), batch on lanes
    x0 = x[0:1, :]                      # (1, TILE_B)
    x1 = x[1:2, :]                      # (1, TILE_B)

    y0 = None
    y1 = None
    # Contraction dims are 2 and 8 -> fully unrolled VPU multiply-adds; the
    # weight scalars come from SMEM so no MXU and no per-tile broadcast ops.
    for j in range(HID):
        hj = w1_ref[j, 0] * x0 + w1_ref[j, 1] * x1 + b1_ref[j]
        hj = jnp.maximum(hj, 0.0)       # ReLU
        t0 = w2_ref[0, j] * hj
        t1 = w2_ref[1, j] * hj
        y0 = t0 if y0 is None else y0 + t0
        y1 = t1 if y1 is None else y1 + t1

    o_ref[0:1, :] = (y0 + b2_ref[0]).astype(o_ref.dtype)
    o_ref[1:2, :] = (y1 + b2_ref[1]).astype(o_ref.dtype)


def _round_up(n, m):
    return ((n + m - 1) // m) * m


@functools.partial(jax.jit, static_argnames=("tile_b",))
def mlp_forward(x, w1, b1, w2, b2, *, tile_b=8192):
    """x: (B, 2). w1: (8, 2), b1: (8,), w2: (2, 8), b2: (2,) (PyTorch layout)."""
    B = x.shape[0]
    x_t = x.T                                           # (2, B): batch -> lanes
    tile = min(_round_up(tile_b, 128), _round_up(B, 128))
    Bp = _round_up(B, tile)
    if Bp != B:
        x_t = jnp.pad(x_t, ((0, 0), (0, Bp - B)))
    grid = (Bp // tile,)

    smem = pl.BlockSpec(memory_space=pltpu.MemorySpace.SMEM)
    y_t = pl.pallas_call(
        mlp_kernel,
        out_shape=jax.ShapeDtypeStruct((F_OUT, Bp), x.dtype),
        grid_spec=pltpu.PrefetchScalarGridSpec(
            num_scalar_prefetch=0,
            grid=grid,
            in_specs=[
                smem,                                          # w1 (8, 2)
                smem,                                          # b1 (8,)
                smem,                                          # w2 (2, 8)
                smem,                                          # b2 (2,)
                pl.BlockSpec((F_IN, tile), lambda i: (0, i)),  # x_t tile
            ],
            out_specs=pl.BlockSpec((F_OUT, tile), lambda i: (0, i)),
        ),
        compiler_params=pltpu.CompilerParams(
            dimension_semantics=("parallel",),                 # megacore-shardable
        ),
    )(w1, b1, w2, b2, x_t)

    return y_t[:, :B].T                                  # back to (B, 2)


def init_params(key):
    """Deterministic init mimicking nn.Linear's U(-1/sqrt(fan_in), 1/sqrt(fan_in))."""
    k1, k2, k3, k4 = jax.random.split(key, 4)
    bound1 = 1.0 / jnp.sqrt(2.0)   # fc1: in_features = 2
    bound2 = 1.0 / jnp.sqrt(8.0)   # fc2: in_features = 8
    w1 = jax.random.uniform(k1, (HID, F_IN), jnp.float32, -bound1, bound1)
    b1 = jax.random.uniform(k2, (HID,), jnp.float32, -bound1, bound1)
    w2 = jax.random.uniform(k3, (F_OUT, HID), jnp.float32, -bound2, bound2)
    b2 = jax.random.uniform(k4, (F_OUT,), jnp.float32, -bound2, bound2)
    return w1, b1, w2, b2


if __name__ == "__main__":
    key = jax.random.PRNGKey(0)
    k_in, k_param = jax.random.split(key)

    batch = 8
    x = jax.random.normal(k_in, (batch, F_IN), jnp.float32)
    w1, b1, w2, b2 = init_params(k_param)

    out = mlp_forward(x, w1, b1, w2, b2)
    out = jax.block_until_ready(out)

    # Pure-JAX reference of the PyTorch forward: relu(x @ W1.T + b1) @ W2.T + b2
    ref = jnp.maximum(x @ w1.T + b1, 0.0) @ w2.T + b2
    assert out.shape == (batch, F_OUT)
    assert jnp.allclose(out, ref, atol=1e-5, rtol=1e-5)

    print("KERNEL_OK")
</pallas_src>

<mosaic_0001>
module attributes {stable_mosaic.version = 11 : i64} {
  func.func @mlp_kernel(%arg0: i32, %arg1: memref<8x2xf32, #tpu.memory_space<smem>>, %arg2: memref<8xf32, #tpu.memory_space<smem>>, %arg3: memref<2x8xf32, #tpu.memory_space<smem>>, %arg4: memref<2xf32, #tpu.memory_space<smem>>, %arg5: memref<2x128xf32, #tpu.memory_space<vmem>>, %arg6: memref<2x128xf32, #tpu.memory_space<vmem>>) attributes {dimension_semantics = [#tpu.dimension_semantics<parallel>], iteration_bounds = array<i64: 1>, scalar_prefetch = 0 : i64, scratch_operands = 0 : i64, tpu.core_type = #tpu.core_type<tc>, window_params = [{transform_indices = @transform_0, window_bounds = array<i64: 8, 2>}, {transform_indices = @transform_1, window_bounds = array<i64: 8>}, {transform_indices = @transform_2, window_bounds = array<i64: 2, 8>}, {transform_indices = @transform_3, window_bounds = array<i64: 2>}, {transform_indices = @transform_4, window_bounds = array<i64: 2, 128>}, {transform_indices = @transform_5, window_bounds = array<i64: 2, 128>}]} {
    %c0 = arith.constant 0 : index
    %c0_0 = arith.constant 0 : index
    %0 = vector.load %arg5[%c0, %c0_0] : memref<2x128xf32, #tpu.memory_space<vmem>>, vector<2x128xf32>
    %1 = vector.extract_strided_slice %0 {offsets = [0, 0], sizes = [1, 128], strides = [1, 1]} : vector<2x128xf32> to vector<1x128xf32>
    %2 = vector.extract_strided_slice %0 {offsets = [1, 0], sizes = [1, 128], strides = [1, 1]} : vector<2x128xf32> to vector<1x128xf32>
    %c0_1 = arith.constant 0 : index
    %c0_2 = arith.constant 0 : index
    %3 = memref.load %arg1[%c0_1, %c0_2] : memref<8x2xf32, #tpu.memory_space<smem>>
    %4 = vector.broadcast %3 : f32 to vector<1x128xf32>
    %5 = arith.mulf %4, %1 : vector<1x128xf32>
    %c0_3 = arith.constant 0 : index
    %c1 = arith.constant 1 : index
    %6 = memref.load %arg1[%c0_3, %c1] : memref<8x2xf32, #tpu.memory_space<smem>>
    %7 = vector.broadcast %6 : f32 to vector<1x128xf32>
    %8 = arith.mulf %7, %2 : vector<1x128xf32>
    %9 = arith.addf %5, %8 : vector<1x128xf32>
    %c0_4 = arith.constant 0 : index
    %10 = memref.load %arg2[%c0_4] : memref<8xf32, #tpu.memory_space<smem>>
    %11 = vector.broadcast %10 : f32 to vector<1x128xf32>
    %12 = arith.addf %9, %11 : vector<1x128xf32>
    %cst = arith.constant 0.000000e+00 : f32
    %13 = vector.broadcast %cst : f32 to vector<1x128xf32>
    %14 = arith.maximumf %12, %13 : vector<1x128xf32>
    %c0_5 = arith.constant 0 : index
    %c0_6 = arith.constant 0 : index
    %15 = memref.load %arg3[%c0_5, %c0_6] : memref<2x8xf32, #tpu.memory_space<smem>>
    %16 = vector.broadcast %15 : f32 to vector<1x128xf32>
    %17 = arith.mulf %16, %14 : vector<1x128xf32>
    %c1_7 = arith.constant 1 : index
    %c0_8 = arith.constant 0 : index
    %18 = memref.load %arg3[%c1_7, %c0_8] : memref<2x8xf32, #tpu.memory_space<smem>>
    %19 = vector.broadcast %18 : f32 to vector<1x128xf32>
    %20 = arith.mulf %19, %14 : vector<1x128xf32>
    %c1_9 = arith.constant 1 : index
    %c0_10 = arith.constant 0 : index
    %21 = memref.load %arg1[%c1_9, %c0_10] : memref<8x2xf32, #tpu.memory_space<smem>>
    %22 = vector.broadcast %21 : f32 to vector<1x128xf32>
    %23 = arith.mulf %22, %1 : vector<1x128xf32>
    %c1_11 = arith.constant 1 : index
    %c1_12 = arith.constant 1 : index
    %24 = memref.load %arg1[%c1_11, %c1_12] : memref<8x2xf32, #tpu.memory_space<smem>>
    %25 = vector.broadcast %24 : f32 to vector<1x128xf32>
    %26 = arith.mulf %25, %2 : vector<1x128xf32>
    %27 = arith.addf %23, %26 : vector<1x128xf32>
    %c1_13 = arith.constant 1 : index
    %28 = memref.load %arg2[%c1_13] : memref<8xf32, #tpu.memory_space<smem>>
    %29 = vector.broadcast %28 : f32 to vector<1x128xf32>
    %30 = arith.addf %27, %29 : vector<1x128xf32>
    %cst_14 = arith.constant 0.000000e+00 : f32
    %31 = vector.broadcast %cst_14 : f32 to vector<1x128xf32>
    %32 = arith.maximumf %30, %31 : vector<1x128xf32>
    %c0_15 = arith.constant 0 : index
    %c1_16 = arith.constant 1 : index
    %33 = memref.load %arg3[%c0_15, %c1_16] : memref<2x8xf32, #tpu.memory_space<smem>>
    %34 = vector.broadcast %33 : f32 to vector<1x128xf32>
    %35 = arith.mulf %34, %32 : vector<1x128xf32>
    %c1_17 = arith.constant 1 : index
    %c1_18 = arith.constant 1 : index
    %36 = memref.load %arg3[%c1_17, %c1_18] : memref<2x8xf32, #tpu.memory_space<smem>>
    %37 = vector.broadcast %36 : f32 to vector<1x128xf32>
    %38 = arith.mulf %37, %32 : vector<1x128xf32>
    %39 = arith.addf %17, %35 : vector<1x128xf32>
    %40 = arith.addf %20, %38 : vector<1x128xf32>
    %c2 = arith.constant 2 : index
    %c0_19 = arith.constant 0 : index
    %41 = memref.load %arg1[%c2, %c0_19] : memref<8x2xf32, #tpu.memory_space<smem>>
    %42 = vector.broadcast %41 : f32 to vector<1x128xf32>
    %43 = arith.mulf %42, %1 : vector<1x128xf32>
    %c2_20 = arith.constant 2 : index
    %c1_21 = arith.constant 1 : index
    %44 = memref.load %arg1[%c2_20, %c1_21] : memref<8x2xf32, #tpu.memory_space<smem>>
    %45 = vector.broadcast %44 : f32 to vector<1x128xf32>
    %46 = arith.mulf %45, %2 : vector<1x128xf32>
    %47 = arith.addf %43, %46 : vector<1x128xf32>
    %c2_22 = arith.constant 2 : index
    %48 = memref.load %arg2[%c2_22] : memref<8xf32, #tpu.memory_space<smem>>
    %49 = vector.broadcast %48 : f32 to vector<1x128xf32>
    %50 = arith.addf %47, %49 : vector<1x128xf32>
    %cst_23 = arith.constant 0.000000e+00 : f32
    %51 = vector.broadcast %cst_23 : f32 to vector<1x128xf32>
    %52 = arith.maximumf %50, %51 : vector<1x128xf32>
    %c0_24 = arith.constant 0 : index
    %c2_25 = arith.constant 2 : index
    %53 = memref.load %arg3[%c0_24, %c2_25] : memref<2x8xf32, #tpu.memory_space<smem>>
    %54 = vector.broadcast %53 : f32 to vector<1x128xf32>
    %55 = arith.mulf %54, %52 : vector<1x128xf32>
    %c1_26 = arith.constant 1 : index
    %c2_27 = arith.constant 2 : index
    %56 = memref.load %arg3[%c1_26, %c2_27] : memref<2x8xf32, #tpu.memory_space<smem>>
    %57 = vector.broadcast %56 : f32 to vector<1x128xf32>
    %58 = arith.mulf %57, %52 : vector<1x128xf32>
    %59 = arith.addf %39, %55 : vector<1x128xf32>
    %60 = arith.addf %40, %58 : vector<1x128xf32>
    %c3 = arith.constant 3 : index
    %c0_28 = arith.constant 0 : index
    %61 = memref.load %arg1[%c3, %c0_28] : memref<8x2xf32, #tpu.memory_space<smem>>
    %62 = vector.broadcast %61 : f32 to vector<1x128xf32>
    %63 = arith.mulf %62, %1 : vector<1x128xf32>
    %c3_29 = arith.constant 3 : index
    %c1_30 = arith.constant 1 : index
    %64 = memref.load %arg1[%c3_29, %c1_30] : memref<8x2xf32, #tpu.memory_space<smem>>
    %65 = vector.broadcast %64 : f32 to vector<1x128xf32>
    %66 = arith.mulf %65, %2 : vector<1x128xf32>
    %67 = arith.addf %63, %66 : vector<1x128xf32>
    %c3_31 = arith.constant 3 : index
    %68 = memref.load %arg2[%c3_31] : memref<8xf32, #tpu.memory_space<smem>>
    %69 = vector.broadcast %68 : f32 to vector<1x128xf32>
    %70 = arith.addf %67, %69 : vector<1x128xf32>
    %cst_32 = arith.constant 0.000000e+00 : f32
    %71 = vector.broadcast %cst_32 : f32 to vector<1x128xf32>
    %72 = arith.maximumf %70, %71 : vector<1x128xf32>
    %c0_33 = arith.constant 0 : index
    %c3_34 = arith.constant 3 : index
    %73 = memref.load %arg3[%c0_33, %c3_34] : memref<2x8xf32, #tpu.memory_space<smem>>
    %74 = vector.broadcast %73 : f32 to vector<1x128xf32>
    %75 = arith.mulf %74, %72 : vector<1x128xf32>
    %c1_35 = arith.constant 1 : index
    %c3_36 = arith.constant 3 : index
    %76 = memref.load %arg3[%c1_35, %c3_36] : memref<2x8xf32, #tpu.memory_space<smem>>
    %77 = vector.broadcast %76 : f32 to vector<1x128xf32>
    %78 = arith.mulf %77, %72 : vector<1x128xf32>
    %79 = arith.addf %59, %75 : vector<1x128xf32>
    %80 = arith.addf %60, %78 : vector<1x128xf32>
    %c4 = arith.constant 4 : index
    %c0_37 = arith.constant 0 : index
    %81 = memref.load %arg1[%c4, %c0_37] : memref<8x2xf32, #tpu.memory_space<smem>>
    %82 = vector.broadcast %81 : f32 to vector<1x128xf32>
    %83 = arith.mulf %82, %1 : vector<1x128xf32>
    %c4_38 = arith.constant 4 : index
    %c1_39 = arith.constant 1 : index
    %84 = memref.load %arg1[%c4_38, %c1_39] : memref<8x2xf32, #tpu.memory_space<smem>>
    %85 = vector.broadcast %84 : f32 to vector<1x128xf32>
    %86 = arith.mulf %85, %2 : vector<1x128xf32>
    %87 = arith.addf %83, %86 : vector<1x128xf32>
    %c4_40 = arith.constant 4 : index
    %88 = memref.load %arg2[%c4_40] : memref<8xf32, #tpu.memory_space<smem>>
    %89 = vector.broadcast %88 : f32 to vector<1x128xf32>
    %90 = arith.addf %87, %89 : vector<1x128xf32>
    %cst_41 = arith.constant 0.000000e+00 : f32
    %91 = vector.broadcast %cst_41 : f32 to vector<1x128xf32>
    %92 = arith.maximumf %90, %91 : vector<1x128xf32>
    %c0_42 = arith.constant 0 : index
    %c4_43 = arith.constant 4 : index
    %93 = memref.load %arg3[%c0_42, %c4_43] : memref<2x8xf32, #tpu.memory_space<smem>>
    %94 = vector.broadcast %93 : f32 to vector<1x128xf32>
    %95 = arith.mulf %94, %92 : vector<1x128xf32>
    %c1_44 = arith.constant 1 : index
    %c4_45 = arith.constant 4 : index
    %96 = memref.load %arg3[%c1_44, %c4_45] : memref<2x8xf32, #tpu.memory_space<smem>>
    %97 = vector.broadcast %96 : f32 to vector<1x128xf32>
    %98 = arith.mulf %97, %92 : vector<1x128xf32>
    %99 = arith.addf %79, %95 : vector<1x128xf32>
    %100 = arith.addf %80, %98 : vector<1x128xf32>
    %c5 = arith.constant 5 : index
    %c0_46 = arith.constant 0 : index
    %101 = memref.load %arg1[%c5, %c0_46] : memref<8x2xf32, #tpu.memory_space<smem>>
    %102 = vector.broadcast %101 : f32 to vector<1x128xf32>
    %103 = arith.mulf %102, %1 : vector<1x128xf32>
    %c5_47 = arith.constant 5 : index
    %c1_48 = arith.constant 1 : index
    %104 = memref.load %arg1[%c5_47, %c1_48] : memref<8x2xf32, #tpu.memory_space<smem>>
    %105 = vector.broadcast %104 : f32 to vector<1x128xf32>
    %106 = arith.mulf %105, %2 : vector<1x128xf32>
    %107 = arith.addf %103, %106 : vector<1x128xf32>
    %c5_49 = arith.constant 5 : index
    %108 = memref.load %arg2[%c5_49] : memref<8xf32, #tpu.memory_space<smem>>
    %109 = vector.broadcast %108 : f32 to vector<1x128xf32>
    %110 = arith.addf %107, %109 : vector<1x128xf32>
    %cst_50 = arith.constant 0.000000e+00 : f32
    %111 = vector.broadcast %cst_50 : f32 to vector<1x128xf32>
    %112 = arith.maximumf %110, %111 : vector<1x128xf32>
    %c0_51 = arith.constant 0 : index
    %c5_52 = arith.constant 5 : index
    %113 = memref.load %arg3[%c0_51, %c5_52] : memref<2x8xf32, #tpu.memory_space<smem>>
    %114 = vector.broadcast %113 : f32 to vector<1x128xf32>
    %115 = arith.mulf %114, %112 : vector<1x128xf32>
    %c1_53 = arith.constant 1 : index
    %c5_54 = arith.constant 5 : index
    %116 = memref.load %arg3[%c1_53, %c5_54] : memref<2x8xf32, #tpu.memory_space<smem>>
    %117 = vector.broadcast %116 : f32 to vector<1x128xf32>
    %118 = arith.mulf %117, %112 : vector<1x128xf32>
    %119 = arith.addf %99, %115 : vector<1x128xf32>
    %120 = arith.addf %100, %118 : vector<1x128xf32>
    %c6 = arith.constant 6 : index
    %c0_55 = arith.constant 0 : index
    %121 = memref.load %arg1[%c6, %c0_55] : memref<8x2xf32, #tpu.memory_space<smem>>
    %122 = vector.broadcast %121 : f32 to vector<1x128xf32>
    %123 = arith.mulf %122, %1 : vector<1x128xf32>
    %c6_56 = arith.constant 6 : index
    %c1_57 = arith.constant 1 : index
    %124 = memref.load %arg1[%c6_56, %c1_57] : memref<8x2xf32, #tpu.memory_space<smem>>
    %125 = vector.broadcast %124 : f32 to vector<1x128xf32>
    %126 = arith.mulf %125, %2 : vector<1x128xf32>
    %127 = arith.addf %123, %126 : vector<1x128xf32>
    %c6_58 = arith.constant 6 : index
    %128 = memref.load %arg2[%c6_58] : memref<8xf32, #tpu.memory_space<smem>>
    %129 = vector.broadcast %128 : f32 to vector<1x128xf32>
    %130 = arith.addf %127, %129 : vector<1x128xf32>
    %cst_59 = arith.constant 0.000000e+00 : f32
    %131 = vector.broadcast %cst_59 : f32 to vector<1x128xf32>
    %132 = arith.maximumf %130, %131 : vector<1x128xf32>
    %c0_60 = arith.constant 0 : index
    %c6_61 = arith.constant 6 : index
    %133 = memref.load %arg3[%c0_60, %c6_61] : memref<2x8xf32, #tpu.memory_space<smem>>
    %134 = vector.broadcast %133 : f32 to vector<1x128xf32>
    %135 = arith.mulf %134, %132 : vector<1x128xf32>
    %c1_62 = arith.constant 1 : index
    %c6_63 = arith.constant 6 : index
    %136 = memref.load %arg3[%c1_62, %c6_63] : memref<2x8xf32, #tpu.memory_space<smem>>
    %137 = vector.broadcast %136 : f32 to vector<1x128xf32>
    %138 = arith.mulf %137, %132 : vector<1x128xf32>
    %139 = arith.addf %119, %135 : vector<1x128xf32>
    %140 = arith.addf %120, %138 : vector<1x128xf32>
    %c7 = arith.constant 7 : index
    %c0_64 = arith.constant 0 : index
    %141 = memref.load %arg1[%c7, %c0_64] : memref<8x2xf32, #tpu.memory_space<smem>>
    %142 = vector.broadcast %141 : f32 to vector<1x128xf32>
    %143 = arith.mulf %142, %1 : vector<1x128xf32>
    %c7_65 = arith.constant 7 : index
    %c1_66 = arith.constant 1 : index
    %144 = memref.load %arg1[%c7_65, %c1_66] : memref<8x2xf32, #tpu.memory_space<smem>>
    %145 = vector.broadcast %144 : f32 to vector<1x128xf32>
    %146 = arith.mulf %145, %2 : vector<1x128xf32>
    %147 = arith.addf %143, %146 : vector<1x128xf32>
    %c7_67 = arith.constant 7 : index
    %148 = memref.load %arg2[%c7_67] : memref<8xf32, #tpu.memory_space<smem>>
    %149 = vector.broadcast %148 : f32 to vector<1x128xf32>
    %150 = arith.addf %147, %149 : vector<1x128xf32>
    %cst_68 = arith.constant 0.000000e+00 : f32
    %151 = vector.broadcast %cst_68 : f32 to vector<1x128xf32>
    %152 = arith.maximumf %150, %151 : vector<1x128xf32>
    %c0_69 = arith.constant 0 : index
    %c7_70 = arith.constant 7 : index
    %153 = memref.load %arg3[%c0_69, %c7_70] : memref<2x8xf32, #tpu.memory_space<smem>>
    %154 = vector.broadcast %153 : f32 to vector<1x128xf32>
    %155 = arith.mulf %154, %152 : vector<1x128xf32>
    %c1_71 = arith.constant 1 : index
    %c7_72 = arith.constant 7 : index
    %156 = memref.load %arg3[%c1_71, %c7_72] : memref<2x8xf32, #tpu.memory_space<smem>>
    %157 = vector.broadcast %156 : f32 to vector<1x128xf32>
    %158 = arith.mulf %157, %152 : vector<1x128xf32>
    %159 = arith.addf %139, %155 : vector<1x128xf32>
    %160 = arith.addf %140, %158 : vector<1x128xf32>
    %c0_73 = arith.constant 0 : index
    %161 = memref.load %arg4[%c0_73] : memref<2xf32, #tpu.memory_space<smem>>
    %162 = vector.broadcast %161 : f32 to vector<1x128xf32>
    %163 = arith.addf %159, %162 : vector<1x128xf32>
    %c0_74 = arith.constant 0 : index
    %c0_75 = arith.constant 0 : index
    %164 = vector.load %arg6[%c0_74, %c0_75] : memref<2x128xf32, #tpu.memory_space<vmem>>, vector<1x128xf32>
    tpu.vector_store %arg6[%c0_74, %c0_75], %163 {strides = array<i32>} : memref<2x128xf32, #tpu.memory_space<vmem>>, vector<1x128xf32>,
    %c1_76 = arith.constant 1 : index
    %165 = memref.load %arg4[%c1_76] : memref<2xf32, #tpu.memory_space<smem>>
    %166 = vector.broadcast %165 : f32 to vector<1x128xf32>
    %167 = arith.addf %160, %166 : vector<1x128xf32>
    %c1_77 = arith.constant 1 : index
    %c0_78 = arith.constant 0 : index
    %168 = vector.load %arg6[%c1_77, %c0_78] : memref<2x128xf32, #tpu.memory_space<vmem>>, vector<1x128xf32>
    tpu.vector_store %arg6[%c1_77, %c0_78], %167 {strides = array<i32>} : memref<2x128xf32, #tpu.memory_space<vmem>>, vector<1x128xf32>,
    return
  }
  func.func @transform_0(%arg0: i32) -> (i32, i32) {
    %c0_i32 = arith.constant 0 : i32
    %c0_i32_0 = arith.constant 0 : i32
    %c0_i32_1 = arith.constant 0 : i32
    return %c0_i32, %c0_i32_0 : i32, i32
  }
  func.func @transform_1(%arg0: i32) -> i32 {
    %c0_i32 = arith.constant 0 : i32
    %c0_i32_0 = arith.constant 0 : i32
    return %c0_i32 : i32
  }
  func.func @transform_2(%arg0: i32) -> (i32, i32) {
    %c0_i32 = arith.constant 0 : i32
    %c0_i32_0 = arith.constant 0 : i32
    %c0_i32_1 = arith.constant 0 : i32
    return %c0_i32, %c0_i32_0 : i32, i32
  }
  func.func @transform_3(%arg0: i32) -> i32 {
    %c0_i32 = arith.constant 0 : i32
    %c0_i32_0 = arith.constant 0 : i32
    return %c0_i32 : i32
  }
  func.func @transform_4(%arg0: i32) -> (i32, i32) {
    %c0_i32 = arith.constant 0 : i32
    %c0_i32_0 = arith.constant 0 : i32
    return %c0_i32, %arg0 : i32, i32
  }
  func.func @transform_5(%arg0: i32) -> (i32, i32) {
    %c0_i32 = arith.constant 0 : i32
    %c0_i32_0 = arith.constant 0 : i32
    return %c0_i32, %arg0 : i32, i32
  }
}

</mosaic_0001>

<bundles_post_ra>
// kernel: mlp_forward.1
= control target key start
LH: loop header
LB: loop body
LE: loop exit
PB: predicated region body
PF: predicated region fallthrough
CT: control target
= control target key end

     0   :  { %10 = vsyncpa [#allocation3], 0  ;;  %s496_s0 = inlined_call_operand.vmem [shape: f32[8,2], index: 0, kind: input, shape index: {}]   ;;  %s497_s1 = inlined_call_operand.vmem [shape: f32[8], index: 1, kind: input, shape index: {}]   ;;  %s498_s2 = inlined_call_operand.vmem [shape: f32[2,8], index: 2, kind: input, shape index: {}]   ;;  %s499_s3 = inlined_call_operand.vmem [shape: f32[2], index: 3, kind: input, shape index: {}]   ;;  %s500_s4 = inlined_call_operand.vmem [shape: f32[2,128], index: 4, kind: input, shape index: {}]   ;;  %s501_s5 = inlined_call_operand.vmem [shape: f32[2,128], index: 5, kind: output, shape index: {}]  }
   0x1   :  { %11 = vsyncpa [#allocation5], 0  ;;  %s29_s20 = sshll.u32 %s497_s1, 4  ;;  %s30_s20 = int_to_ptr.vmem [resolvable:$true] %s29_s20 }
   0x2   :  { %12 = vsyncpa [#allocation8], 0  ;;  %s19_s23 = sshll.u32 %s496_s0, 4  ;;  %s300_s24 = scalar_lea.vmem %s30_s20, 16  ;;  %s20_s23 = int_to_ptr.vmem [resolvable:$true] %s19_s23 }
   0x3   :  { %p301_p0 = scmp.ne.s32.totalorder %s30_s20, %s300_s24  ;;  %p305_p1 = scmp.lt.s32.totalorder %s30_s20, %s30_s20 }
   0x4   :  { %p306_p2 = scmp.lt.s32.totalorder %s300_s24, %s300_s24 }
   0x6   :  { %p307_p3 = por %p306_p2, %p305_p1 }
   0x8   :  { %p308_p4 = pnand %p307_p3, %p301_p0 }
   0xa   :  { %311 = shalt.err (!%p308_p4)
}
   0xb   :  { %s354_s25 = smov [#allocation4]   ;;  %s312_s26 = scalar_lea.vmem %s20_s23, 128 }
   0xc   :  { %32 = dma.vmem_to_smem %s30_s20, 16, %s354_s25, [#allocation5]  }
   0xd   :  { %p313_p5 = scmp.ne.s32.totalorder %s20_s23, %s312_s26  ;;  %p317_p6 = scmp.lt.s32.totalorder %s20_s23, %s20_s23 }
   0xe   :  { %p318_p7 = scmp.lt.s32.totalorder %s312_s26, %s312_s26 }
  0x10   :  { %p319_p8 = por %p318_p7, %p317_p6 }
  0x12   :  { %p320_p9 = pnand %p319_p8, %p313_p5 }
  0x14   :  { %323 = shalt.err (!%p320_p9)
}
  0x15   :  { %s355_s1 = smov [#allocation2]   ;;  %s39_s28 = sshll.u32 %s498_s2, 4  ;;  %s40_s28 = int_to_ptr.vmem [resolvable:$true] %s39_s28 }
  0x16   :  { %22 = dma.vmem_to_smem %s20_s23, 128, %s355_s1, [#allocation3]  }
  0x17   :  { %s49_s6 = sshll.u32 %s499_s3, 4  ;;  %s324_s7 = scalar_lea.vmem %s40_s28, 32  ;;  %s50_s6 = int_to_ptr.vmem [resolvable:$true] %s49_s6 }
  0x18   :  { %p325_p10 = scmp.ne.s32.totalorder %s40_s28, %s324_s7  ;;  %p329_p11 = scmp.lt.s32.totalorder %s40_s28, %s40_s28 }
  0x19   :  { %p330_p12 = scmp.lt.s32.totalorder %s324_s7, %s324_s7 }
  0x1b   :  { %p331_p13 = por %p330_p12, %p329_p11 }
  0x1d   :  { %p332_p0 = pnand %p331_p13, %p325_p10 }
  0x1f   :  { %335 = shalt.err (!%p332_p0)
}
  0x20   :  { %s356_s8 = smov [#allocation6]   ;;  %s336_s9 = scalar_lea.vmem %s50_s6, 16 }
  0x21   :  { %42 = dma.vmem_to_smem %s40_s28, 32, %s356_s8, [#allocation5]  }
  0x22   :  { %p337_p1 = scmp.ne.s32.totalorder %s50_s6, %s336_s9  ;;  %p341_p2 = scmp.lt.s32.totalorder %s50_s6, %s50_s6 }
  0x23   :  { %p342_p3 = scmp.lt.s32.totalorder %s336_s9, %s336_s9 }
  0x25   :  { %p343_p4 = por %p342_p3, %p341_p2 }
  0x27   :  { %p344_p5 = pnand %p343_p4, %p337_p1 }
  0x29   :  { %347 = shalt.err (!%p344_p5)
}
  0x2a   :  { %s357_s2 = smov [#allocation7]  }
  0x2b   :  { %52 = dma.vmem_to_smem %s50_s6, 16, %s357_s2, [#allocation8]  }
  0x2c   :  { %348 = dma.done.wait [#allocation3], 128  }
  0x2d   :  { %349 = vsyncadd [#allocation3], 4294967168 }
  0x2e   :  { %350 = dma.done.wait [#allocation5], 48  }
  0x2f   :  { %351 = vsyncadd [#allocation5], 4294967248 }
  0x30   :  { %352 = dma.done.wait [#allocation8], 16  }
  0x31   :  { %353 = vsyncadd [#allocation8], 4294967280 }
  0x32   :  { %67 = sfence }
  0x33   :  { %s69_s3 = sld [smem:[#allocation2]]  ;;  %v405_v0 = vld [vmem:[%s500_s4] sm:$0x3] }
  0x34   :  { %s258_s10 = sld [smem:[#allocation2 + $0x1]] }
  0x35   :  { %s79_s11 = sld [smem:[#allocation4]] }
  0x36   :  { %s400_s12 = sld [smem:[#allocation6]] }
  0x37   :  { %s260_s15 = sld [smem:[#allocation2 + $0x80]] }
  0x38   :  { %s261_s16 = sld [smem:[#allocation2 + $0x81]] }
  0x39   :  { %v70_v1 = vstv %s69_s3  ;;  %s407_s17 = sld [smem:[#allocation6 + $0x80]] }
  0x3a   :  { %v73_v2 = vstv %s258_s10  ;;  %v71_v3 = vmul.f32 %v70_v1, %v405_v0  ;;  %s262_s18 = sld [smem:[#allocation4 + $0x1]] }
  0x3b   :  { %v74_v4 = vmul.f32 %v73_v2, %v405_v0  ;;  %s411_s19 = sld [smem:[#allocation6 + $0x1]]  ;;  %v80_v6 = vstv %s79_s11 }
  0x3c   :  { %s265_s20 = sld [smem:[#allocation2 + $0x100]]  ;;  %v84_v21 = vstv %s400_s12 }
  0x3d   :  { %v76_v5 = vrot.slane %v74_v4, 1  ;;  %v90_v7 = vstv %s260_s15  ;;  %s266_s21 = sld [smem:[#allocation2 + $0x101]] }
  0x3e   :  { %v93_v9 = vstv %s261_s16  ;;  %s413_s4 = sld [smem:[#allocation6 + $0x81]]  ;;  %v91_v10 = vmul.f32 %v90_v7, %v405_v0 }
  0x3f   :  { %v78_v8 = vadd.f32 %v76_v5, %v71_v3  ;;  %v94_v11 = vmul.f32 %v93_v9, %v405_v0  ;;  %s417_s22 = sld [smem:[#allocation4 + $0x2]]  ;;  %v87_v22 = vstv %s407_s17 }
  0x40   :  { %s419_s23 = sld [smem:[#allocation6 + $0x2]]  ;;  %v100_v14 = vstv %s262_s18 }
  0x41   :  { %v81_v12 = vadd.f32 %v80_v6, %v78_v8  ;;  %v96_v13 = vrot.slane %v94_v11, 1  ;;  %s270_s24 = sld [smem:[#allocation2 + $0x180]]  ;;  %v104_v24 = vstv %s411_s19 }
  0x42   :  { %v112_v15 = vstv %s265_s20  ;;  %s271_s25 = sld [smem:[#allocation2 + $0x181]] }
  0x43   :  { %v98_v16 = vadd.f32 %v96_v13, %v91_v10  ;;  %v115_v17 = vstv %s266_s21  ;;  %s421_s26 = sld [smem:[#allocation6 + $0x82]]  ;;  %v82_v18 = vmax.f32 %v81_v12, 0.0  ;;  %v113_v19 = vmul.f32 %v112_v15, %v405_v0 }
  0x44   :  { %v116_v20 = vmul.f32 %v115_v17, %v405_v0  ;;  %s425_s1 = sld [smem:[#allocation4 + $0x3]]  ;;  %v107_v25 = vstv %s413_s4 }
  0x45   :  { %v101_v23 = vadd.f32 %v100_v14, %v98_v16  ;;  %s429_s0 = sld [smem:[#allocation6 + $0x3]]  ;;  %v122_v28 = vstv %s417_s22  ;;  %v85_v30 = vmul.f32 %v84_v21, %v82_v18  ;;  %v88_v31 = vmul.f32 %v87_v22, %v82_v18 }
  0x46   :  { %v118_v26 = vrot.slane %v116_v20, 1  ;;  %s433_s27 = sld [smem:[#allocation2 + $0x200]]  ;;  %v126_v39 = vstv %s419_s23 }
  0x47   :  { %v102_v27 = vmax.f32 %v101_v23, 0.0  ;;  %v134_v29 = vstv %s270_s24  ;;  %s276_s28 = sld [smem:[#allocation2 + $0x201]] }
  0x48   :  { %v120_v32 = vadd.f32 %v118_v26, %v113_v19  ;;  %v137_v33 = vstv %s271_s25  ;;  %s436_s29 = sld [smem:[#allocation6 + $0x83]]  ;;  %v135_v36 = vmul.f32 %v134_v29, %v405_v0 }
  0x49   :  { %v105_v34 = vmul.f32 %v104_v24, %v102_v27  ;;  %v108_v35 = vmul.f32 %v107_v25, %v102_v27  ;;  %v138_v37 = vmul.f32 %v137_v33, %v405_v0  ;;  %s440_s30 = sld [smem:[#allocation4 + $0x4]]  ;;  %v129_v40 = vstv %s421_s26 }
  0x4a   :  { %v123_v38 = vadd.f32 %v122_v28, %v120_v32  ;;  %s442_s6 = sld [smem:[#allocation6 + $0x4]]  ;;  %v144_v43 = vstv %s425_s1 }
  0x4b   :  { %v140_v41 = vrot.slane %v138_v37, 1  ;;  %s446_s7 = sld [smem:[#allocation2 + $0x280]]  ;;  %v109_v45 = vadd.f32 %v105_v34, %v85_v30  ;;  %v110_v46 = vadd.f32 %v108_v35, %v88_v31  ;;  %v148_v54 = vstv %s429_s0 }
  0x4c   :  { %v124_v42 = vmax.f32 %v123_v38, 0.0  ;;  %v156_v44 = vstv %s433_s27  ;;  %s281_s8 = sld [smem:[#allocation2 + $0x281]] }
  0x4d   :  { %v142_v47 = vadd.f32 %v140_v41, %v135_v36  ;;  %v159_v48 = vstv %s276_s28  ;;  %s450_s9 = sld [smem:[#allocation6 + $0x84]]  ;;  %v157_v51 = vmul.f32 %v156_v44, %v405_v0 }
  0x4e   :  { %v127_v49 = vmul.f32 %v126_v39, %v124_v42  ;;  %v130_v50 = vmul.f32 %v129_v40, %v124_v42  ;;  %v160_v52 = vmul.f32 %v159_v48, %v405_v0  ;;  %s454_s2 = sld [smem:[#allocation4 + $0x5]]  ;;  %v151_v55 = vstv %s436_s29 }
  0x4f   :  { %v145_v53 = vadd.f32 %v144_v43, %v142_v47  ;;  %s456_s3 = sld [smem:[#allocation6 + $0x5]]  ;;  %v166_v58 = vstv %s440_s30 }
  0x50   :  { %v162_v56 = vrot.slane %v160_v52, 1  ;;  %s460_s10 = sld [smem:[#allocation2 + $0x300]]  ;;  %v131_v60 = vadd.f32 %v127_v49, %v109_v45  ;;  %v132_v61 = vadd.f32 %v130_v50, %v110_v46  ;;  %v170_v6 = vstv %s442_s6 }
  0x51   :  { %v146_v57 = vmax.f32 %v145_v53, 0.0  ;;  %v178_v59 = vstv %s446_s7  ;;  %s286_s11 = sld [smem:[#allocation2 + $0x301]] }
  0x52   :  { %v164_v62 = vadd.f32 %v162_v56, %v157_v51  ;;  %v181_v63 = vstv %s281_s8  ;;  %s464_s12 = sld [smem:[#allocation6 + $0x85]]  ;;  %v179_v3 = vmul.f32 %v178_v59, %v405_v0 }
  0x53   :  { %v149_v1 = vmul.f32 %v148_v54, %v146_v57  ;;  %v152_v2 = vmul.f32 %v151_v55, %v146_v57  ;;  %v182_v4 = vmul.f32 %v181_v63, %v405_v0  ;;  %s468_s13 = sld [smem:[#allocation4 + $0x6]]  ;;  %v173_v7 = vstv %s450_s9 }
  0x54   :  { %v167_v5 = vadd.f32 %v166_v58, %v164_v62  ;;  %s470_s14 = sld [smem:[#allocation6 + $0x6]]  ;;  %v188_v10 = vstv %s454_s2 }
  0x55   :  { %v184_v8 = vrot.slane %v182_v4, 1  ;;  %s290_s15 = sld [smem:[#allocation2 + $0x380]]  ;;  %v153_v12 = vadd.f32 %v149_v1, %v131_v60  ;;  %v154_v13 = vadd.f32 %v152_v2, %v132_v61  ;;  %v192_v21 = vstv %s456_s3 }
  0x56   :  { %v168_v9 = vmax.f32 %v167_v5, 0.0  ;;  %v200_v11 = vstv %s460_s10  ;;  %s291_s16 = sld [smem:[#allocation2 + $0x381]] }
  0x57   :  { %v186_v14 = vadd.f32 %v184_v8, %v179_v3  ;;  %v203_v15 = vstv %s286_s11  ;;  %s476_s17 = sld [smem:[#allocation6 + $0x86]]  ;;  %v201_v18 = vmul.f32 %v200_v11, %v405_v0 }
  0x58   :  { %v171_v16 = vmul.f32 %v170_v6, %v168_v9  ;;  %v174_v17 = vmul.f32 %v173_v7, %v168_v9  ;;  %v204_v19 = vmul.f32 %v203_v15, %v405_v0  ;;  %s480_s18 = sld [smem:[#allocation4 + $0x7]]  ;;  %v195_v22 = vstv %s464_s12 }
  0x59   :  { %v189_v20 = vadd.f32 %v188_v10, %v186_v14  ;;  %v210_v25 = vstv %s468_s13  ;;  %s293_s19 = sld [smem:[#allocation6 + $0x7]] }
  0x5a   :  { %v206_v23 = vrot.slane %v204_v19, 1  ;;  %v175_v27 = vadd.f32 %v171_v16, %v153_v12  ;;  %v176_v28 = vadd.f32 %v174_v17, %v154_v13  ;;  %s294_s20 = sld [smem:[#allocation6 + $0x87]]  ;;  %v214_v36 = vstv %s470_s14 }
  0x5b   :  { %v190_v24 = vmax.f32 %v189_v20, 0.0  ;;  %v222_v26 = vstv %s290_s15  ;;  %s243_s21 = sld [smem:[#allocation7]] }
  0x5c   :  { %v208_v29 = vadd.f32 %v206_v23, %v201_v18  ;;  %v225_v30 = vstv %s291_s16  ;;  %v223_v33 = vmul.f32 %v222_v26, %v405_v0  ;;  %s295_s4 = sld [smem:[#allocation7 + $0x1]] }
  0x5d   :  { %v193_v31 = vmul.f32 %v192_v21, %v190_v24  ;;  %v196_v32 = vmul.f32 %v195_v22, %v190_v24  ;;  %v226_v34 = vmul.f32 %v225_v30, %v405_v0  ;;  %v217_v37 = vstv %s476_s17 }
  0x5e   :  { %v211_v35 = vadd.f32 %v210_v25, %v208_v29  ;;  %v232_v40 = vstv %s480_s18 }
  0x5f   :  { %v228_v38 = vrot.slane %v226_v34, 1  ;;  %v197_v41 = vadd.f32 %v193_v31, %v175_v27  ;;  %v198_v42 = vadd.f32 %v196_v32, %v176_v28  ;;  %v236_v47 = vstv %s293_s19 }
  0x60   :  { %v212_v39 = vmax.f32 %v211_v35, 0.0  ;;  %v239_v48 = vstv %s294_s20 }
  0x61   :  { %v230_v43 = vadd.f32 %v228_v38, %v223_v33  ;;  %v244_v53 = vstv %s243_s21 }
  0x62   :  { %v215_v44 = vmul.f32 %v214_v36, %v212_v39  ;;  %v218_v45 = vmul.f32 %v217_v37, %v212_v39  ;;  %v248_v54 = vstv %s295_s4 }
  0x63   :  { %v233_v46 = vadd.f32 %v232_v40, %v230_v43 }
  0x64   :  { %v219_v49 = vadd.f32 %v215_v44, %v197_v41  ;;  %v220_v50 = vadd.f32 %v218_v45, %v198_v42 }
  0x65   :  { %v234_v51 = vmax.f32 %v233_v46, 0.0 }
  0x67   :  { %v237_v0 = vmul.f32 %v236_v47, %v234_v51  ;;  %v240_v52 = vmul.f32 %v239_v48, %v234_v51 }
  0x69   :  { %v241_v55 = vadd.f32 %v237_v0, %v219_v49  ;;  %v242_v56 = vadd.f32 %v240_v52, %v220_v50 }
  0x6b   :  { %v245_v57 = vadd.f32 %v244_v53, %v241_v55  ;;  %v249_v58 = vadd.f32 %v248_v54, %v242_v56 }
  0x6d   :  { %246 = vst [vmem:[%s501_s5] sm:$0x1] %v245_v57  ;;  %250 = vst [vmem:[%s501_s5 + $0x1] sm:$0x1] %v249_v58 }
  0x6e   :  { %255 = vsyncpa [#allocation3], 1 }
  0x6f   :  { %256 = vsyncpa [#allocation5], 1 }
  0x70   :  { %257 = vsyncpa [#allocation8], 1 }

</bundles_post_ra>
